<compile_context>
chip_gen: v7x
topology: tpu7x:2x2x1
jax: 0.10.0
libtpu: 0.0.40
codegen_flags: <defaults>
</compile_context>

<pallas_src>
import functools
import math

import jax
import jax.numpy as jnp
from jax.experimental import pallas as pl
from jax.experimental.pallas import tpu as pltpu


def _round_up(x: int, m: int) -> int:
    return ((x + m - 1) // m) * m


def _default_tb(param_dtype) -> int:
    # f32 activations: TB=512 keeps acc (+ h) around ~32 of 64 vregs (no spill);
    # bf16 h halves its vreg footprint, so TB=1024 is safe.
    return 1024 if jnp.dtype(param_dtype).itemsize < 4 else 512


def _default_tanh_in_param_dtype(param_dtype) -> bool:
    # bf16 tanh only pays off where the EUP/VPU have a bf16 datapath (v6e/v7x).
    # v5e (and older) keep tanh in f32; f32 runs obviously keep f32.
    if jnp.dtype(param_dtype) == jnp.dtype(jnp.float32):
        return False
    try:
        kind = jax.devices()[0].device_kind.lower()
    except Exception:  # pragma: no cover - defensive
        return False
    return ("v6" in kind) or ("v7" in kind)


def _choose_tile(batch: int, tb: int) -> int:
    bp = _round_up(batch, 128)
    tile = min(tb, bp)
    # Aim for >=2 grid steps (feeds both v7x TensorCores via the "parallel"
    # grid axis) whenever the batch is big enough; harmless on v5e/v6e.
    if tile >= 256 and pl.cdiv(batch, tile) < 2:
        tile = _round_up(pl.cdiv(batch, 2), 128)
    return max(tile, 128)


# ----------------------------------------------------------------------------
# Kernel factory: fused MLP on one batch tile.
#   refs = (x_ref, bias_all_ref, w0_ref, ..., w{L-1}_ref, out_ref)
#   activations: [features, TB] (batch on lanes -> lane-dense stores);
#   weights stay in PyTorch layout [fan_out, fan_in]; h = W @ h + b.
#   tanh after every Linear except the last (matches the PyTorch module).
# ----------------------------------------------------------------------------
def _make_mlp_kernel(num_linear, bias_offsets, bias_sizes, tanh_in_param_dtype):
    def kernel(x_ref, ball_ref, *rest):
        w_refs = rest[:num_linear]
        out_ref = rest[num_linear]

        h = x_ref[...]                                        # [in_dim, TB]
        for i in range(num_linear):
            w = w_refs[i][...]                                # [fan_out, fan_in]
            off, n = bias_offsets[i], bias_sizes[i]
            b = ball_ref[off:off + n, :]                      # f32 [fan_out, 1]
            acc = jnp.dot(w, h, preferred_element_type=jnp.float32) + b  # MXU f32
            if i < num_linear - 1:
                if tanh_in_param_dtype:
                    h = jnp.tanh(acc.astype(w.dtype))         # bf16 EUP (v6e/v7x)
                else:
                    h = jnp.tanh(acc).astype(w.dtype)         # f32 EUP
            else:
                h = acc
        out_ref[...] = h.astype(out_ref.dtype)                # lane-dense store

    return kernel


# ----------------------------------------------------------------------------
# Feature-major forward (preferred): x_fm [in_dim, batch] -> [out_dim, batch].
# No transposes, no explicit padding: partial last block handled by Pallas.
# ----------------------------------------------------------------------------
@functools.partial(jax.jit,
                   static_argnames=("param_dtype", "tb", "tanh_in_param_dtype"))
def mlp_forward_fm(x_fm, params, *, param_dtype=jnp.float32, tb=None,
                   tanh_in_param_dtype=None):
    if tb is None:
        tb = _default_tb(param_dtype)
    if tanh_in_param_dtype is None:
        tanh_in_param_dtype = _default_tanh_in_param_dtype(param_dtype)

    in_dim, batch = x_fm.shape
    num_linear = len(params)
    out_dim = params[-1][0].shape[0]
    out_dtype = x_fm.dtype

    tile = _choose_tile(batch, tb)
    grid = (pl.cdiv(batch, tile),)

    x_c = x_fm.astype(param_dtype)
    weights = [w.astype(param_dtype) for w, _ in params]

    # All biases in one resident f32 operand, sliced statically in the kernel.
    bias_sizes = tuple(int(b.shape[0]) for _, b in params)
    bias_offsets = tuple(int(sum(bias_sizes[:i])) for i in range(num_linear))
    b_all = jnp.concatenate([b.astype(jnp.float32) for _, b in params]
                            ).reshape(-1, 1)

    in_specs = [pl.BlockSpec((in_dim, tile), lambda i: (0, i)),      # x tile
                pl.BlockSpec(b_all.shape, lambda i: (0, 0))]         # biases
    # Full-array blocks + constant index_map -> fetched once, resident in VMEM.
    in_specs += [pl.BlockSpec(w.shape, lambda i: (0, 0)) for w in weights]

    # Advisory cost estimate so XLA doesn't treat the fused call as zero-cost.
    itemsize = jnp.dtype(param_dtype).itemsize
    flops = 2 * batch * sum(int(w.shape[0] * w.shape[1]) for w, _ in params)
    transcendentals = batch * sum(int(w.shape[0]) for w, _ in params[:-1])
    bytes_accessed = (int(x_c.size) * itemsize
                      + out_dim * batch * jnp.dtype(out_dtype).itemsize
                      + sum(int(w.size) for w in weights) * itemsize
                      + int(b_all.size) * 4)

    kernel = _make_mlp_kernel(num_linear, bias_offsets, bias_sizes,
                              tanh_in_param_dtype)

    return pl.pallas_call(
        kernel,
        out_shape=jax.ShapeDtypeStruct((out_dim, batch), out_dtype),
        grid=grid,
        in_specs=in_specs,
        out_specs=pl.BlockSpec((out_dim, tile), lambda i: (0, i)),
        compiler_params=pltpu.CompilerParams(
            dimension_semantics=("parallel",)),
        cost_estimate=pl.CostEstimate(
            flops=int(flops),
            transcendentals=int(transcendentals),
            bytes_accessed=int(bytes_accessed)),
    )(x_c, b_all, *weights)


# Convenience batch-major interface matching the PyTorch module:
# x [batch, in_dim] -> [batch, out_dim].  Prefer mlp_forward_fm to skip the
# two transposes entirely (the PiNN caller can keep x feature-major).
def mlp_forward(x, params, **kwargs):
    return mlp_forward_fm(x.T, params, **kwargs).T


# ----------------------------------------------------------------------------
# Deterministic parameter init (mimics torch.nn.Linear default init:
# U(-1/sqrt(fan_in), 1/sqrt(fan_in)) for both weight and bias), PyTorch layout.
# ----------------------------------------------------------------------------
def init_mlp_params(key, in_dim, out_dim, hidden_size, hidden_layers,
                    dtype=jnp.float32):
    assert hidden_layers > 0 and hidden_size > 0
    dims = [in_dim] + [hidden_size] * (hidden_layers + 1) + [out_dim]
    params = []
    for fan_in, fan_out in zip(dims[:-1], dims[1:]):
        key, kw, kb = jax.random.split(key, 3)
        bound = 1.0 / math.sqrt(fan_in)
        w = jax.random.uniform(kw, (fan_out, fan_in), dtype, -bound, bound)
        b = jax.random.uniform(kb, (fan_out,), dtype, -bound, bound)
        params.append((w, b))
    return params


# Pure-JAX reference (same math as the PyTorch module).
def mlp_reference(x, params):
    h = x
    n = len(params)
    for i, (w, b) in enumerate(params):
        h = h @ w.T + b
        if i < n - 1:
            h = jnp.tanh(h)
    return h


# ----------------------------------------------------------------------------
# Main
# ----------------------------------------------------------------------------
if __name__ == "__main__":
    key = jax.random.PRNGKey(0)

    batch = 8
    in_dim = 4
    out_dim = 2
    hidden_size = 32
    hidden_layers = 2   # -> Linear layers: 4->32, 32->32, 32->32, 32->2

    key, kx = jax.random.split(key)
    x = jax.random.normal(kx, (batch, in_dim), dtype=jnp.float32)
    params = init_mlp_params(key, in_dim, out_dim, hidden_size, hidden_layers)

    # --- f32, batch-major convenience path (single partial block), tight tol.
    out = jax.block_until_ready(mlp_forward(x, params))
    ref = mlp_reference(x, params)
    assert out.shape == (batch, out_dim), out.shape
    assert jnp.allclose(out, ref, atol=1e-4, rtol=1e-4), "f32 mismatch vs reference"

    # --- feature-major path with a multi-step grid (batch=300 -> 2 tiles of 256,
    #     partial last block) to exercise the cdiv grid + masked stores.
    key, kx2 = jax.random.split(key)
    x2 = jax.random.normal(kx2, (300, in_dim), dtype=jnp.float32)
    out2_fm = jax.block_until_ready(mlp_forward_fm(x2.T, params))
    ref2 = mlp_reference(x2, params)
    assert out2_fm.shape == (out_dim, 300), out2_fm.shape
    assert jnp.allclose(out2_fm.T, ref2, atol=1e-4, rtol=1e-4), "gridded f32 mismatch"

    # --- bf16 weights/activations (bf16 tanh auto-enabled on v6e/v7x only;
    #     MXU accumulation and bias add stay f32). Compare against a reference
    #     using the same bf16-rounded params.
    out_bf16 = jax.block_until_ready(
        mlp_forward(x, params, param_dtype=jnp.bfloat16))
    params_q = [(w.astype(jnp.bfloat16).astype(jnp.float32), b) for w, b in params]
    ref_bf16 = mlp_reference(x.astype(jnp.bfloat16).astype(jnp.float32), params_q)
    assert jnp.allclose(out_bf16, ref_bf16, atol=5e-2, rtol=5e-2), "bf16 mismatch"

    print("KERNEL_OK")
</pallas_src>

<mosaic_0001>
module attributes {stable_mosaic.version = 11 : i64} {
  func.func @kernel(%arg0: i32, %arg1: memref<4x128xf32, #tpu.memory_space<vmem>>, %arg2: memref<98x1xf32, #tpu.memory_space<vmem>>, %arg3: memref<32x4xf32, #tpu.memory_space<vmem>>, %arg4: memref<32x32xf32, #tpu.memory_space<vmem>>, %arg5: memref<32x32xf32, #tpu.memory_space<vmem>>, %arg6: memref<2x32xf32, #tpu.memory_space<vmem>>, %arg7: memref<2x128xf32, #tpu.memory_space<vmem>>) attributes {dimension_semantics = [#tpu.dimension_semantics<parallel>], iteration_bounds = array<i64: 1>, scalar_prefetch = 0 : i64, scratch_operands = 0 : i64, tpu.core_type = #tpu.core_type<tc>, window_params = [{transform_indices = @transform_0, window_bounds = array<i64: 4, 128>}, {pipeline_mode = #tpu.pipeline_mode<synchronous>, transform_indices = @transform_1, window_bounds = array<i64: 98, 1>}, {pipeline_mode = #tpu.pipeline_mode<synchronous>, transform_indices = @transform_2, window_bounds = array<i64: 32, 4>}, {pipeline_mode = #tpu.pipeline_mode<synchronous>, transform_indices = @transform_3, window_bounds = array<i64: 32, 32>}, {pipeline_mode = #tpu.pipeline_mode<synchronous>, transform_indices = @transform_4, window_bounds = array<i64: 32, 32>}, {pipeline_mode = #tpu.pipeline_mode<synchronous>, transform_indices = @transform_5, window_bounds = array<i64: 2, 32>}, {transform_indices = @transform_6, window_bounds = array<i64: 2, 128>}]} {
    %c0 = arith.constant 0 : index
    %c0_0 = arith.constant 0 : index
    %0 = vector.load %arg1[%c0, %c0_0] : memref<4x128xf32, #tpu.memory_space<vmem>>, vector<4x128xf32>
    %c0_1 = arith.constant 0 : index
    %c0_2 = arith.constant 0 : index
    %1 = vector.load %arg3[%c0_1, %c0_2] : memref<32x4xf32, #tpu.memory_space<vmem>>, vector<32x4xf32>
    %c0_3 = arith.constant 0 : index
    %c0_4 = arith.constant 0 : index
    %2 = vector.load %arg2[%c0_3, %c0_4] : memref<98x1xf32, #tpu.memory_space<vmem>>, vector<32x1xf32>
    %cst = arith.constant dense<0.000000e+00> : vector<32x128xf32>
    %3 = tpu.matmul %1, %0, %cst {dimension_numbers = #tpu.dot_dimension_numbers<[1], [0], [0], [1], [0, 0, 1, 1], [], []>} : vector<32x4xf32>, vector<4x128xf32>, vector<32x128xf32> -> vector<32x128xf32>
    %4 = vector.broadcast %2 : vector<32x1xf32> to vector<32x128xf32>
    %5 = arith.addf %3, %4 : vector<32x128xf32>
    %6 = math.tanh %5 : vector<32x128xf32>
    %c0_5 = arith.constant 0 : index
    %c0_6 = arith.constant 0 : index
    %7 = vector.load %arg4[%c0_5, %c0_6] : memref<32x32xf32, #tpu.memory_space<vmem>>, vector<32x32xf32>
    %c32 = arith.constant 32 : index
    %c0_7 = arith.constant 0 : index
    %8 = vector.load %arg2[%c32, %c0_7] : memref<98x1xf32, #tpu.memory_space<vmem>>, vector<32x1xf32>
    %cst_8 = arith.constant dense<0.000000e+00> : vector<32x128xf32>
    %9 = tpu.matmul %7, %6, %cst_8 {dimension_numbers = #tpu.dot_dimension_numbers<[1], [0], [0], [1], [0, 0, 1, 1], [], []>} : vector<32x32xf32>, vector<32x128xf32>, vector<32x128xf32> -> vector<32x128xf32>
    %10 = vector.broadcast %8 : vector<32x1xf32> to vector<32x128xf32>
    %11 = arith.addf %9, %10 : vector<32x128xf32>
    %12 = math.tanh %11 : vector<32x128xf32>
    %c0_9 = arith.constant 0 : index
    %c0_10 = arith.constant 0 : index
    %13 = vector.load %arg5[%c0_9, %c0_10] : memref<32x32xf32, #tpu.memory_space<vmem>>, vector<32x32xf32>
    %c64 = arith.constant 64 : index
    %c0_11 = arith.constant 0 : index
    %14 = vector.load %arg2[%c64, %c0_11] : memref<98x1xf32, #tpu.memory_space<vmem>>, vector<32x1xf32>
    %cst_12 = arith.constant dense<0.000000e+00> : vector<32x128xf32>
    %15 = tpu.matmul %13, %12, %cst_12 {dimension_numbers = #tpu.dot_dimension_numbers<[1], [0], [0], [1], [0, 0, 1, 1], [], []>} : vector<32x32xf32>, vector<32x128xf32>, vector<32x128xf32> -> vector<32x128xf32>
    %16 = vector.broadcast %14 : vector<32x1xf32> to vector<32x128xf32>
    %17 = arith.addf %15, %16 : vector<32x128xf32>
    %18 = math.tanh %17 : vector<32x128xf32>
    %c0_13 = arith.constant 0 : index
    %c0_14 = arith.constant 0 : index
    %19 = vector.load %arg6[%c0_13, %c0_14] : memref<2x32xf32, #tpu.memory_space<vmem>>, vector<2x32xf32>
    %c96 = arith.constant 96 : index
    %c0_15 = arith.constant 0 : index
    %20 = vector.load %arg2[%c96, %c0_15] : memref<98x1xf32, #tpu.memory_space<vmem>>, vector<2x1xf32>
    %cst_16 = arith.constant dense<0.000000e+00> : vector<2x128xf32>
    %21 = tpu.matmul %19, %18, %cst_16 {dimension_numbers = #tpu.dot_dimension_numbers<[1], [0], [0], [1], [0, 0, 1, 1], [], []>} : vector<2x32xf32>, vector<32x128xf32>, vector<2x128xf32> -> vector<2x128xf32>
    %22 = vector.broadcast %20 : vector<2x1xf32> to vector<2x128xf32>
    %23 = arith.addf %21, %22 : vector<2x128xf32>
    %c0_17 = arith.constant 0 : index
    %c0_18 = arith.constant 0 : index
    %24 = vector.load %arg7[%c0_17, %c0_18] : memref<2x128xf32, #tpu.memory_space<vmem>>, vector<2x128xf32>
    tpu.vector_store %arg7[%c0_17, %c0_18], %23 {strides = array<i32>} : memref<2x128xf32, #tpu.memory_space<vmem>>, vector<2x128xf32>,
    return
  }
  func.func @transform_0(%arg0: i32) -> (i32, i32) {
    %c0_i32 = arith.constant 0 : i32
    %c0_i32_0 = arith.constant 0 : i32
    return %c0_i32, %arg0 : i32, i32
  }
  func.func @transform_1(%arg0: i32) -> (i32, i32) {
    %c0_i32 = arith.constant 0 : i32
    %c0_i32_0 = arith.constant 0 : i32
    %c0_i32_1 = arith.constant 0 : i32
    return %c0_i32, %c0_i32_0 : i32, i32
  }
  func.func @transform_2(%arg0: i32) -> (i32, i32) {
    %c0_i32 = arith.constant 0 : i32
    %c0_i32_0 = arith.constant 0 : i32
    %c0_i32_1 = arith.constant 0 : i32
    return %c0_i32, %c0_i32_0 : i32, i32
  }
  func.func @transform_3(%arg0: i32) -> (i32, i32) {
    %c0_i32 = arith.constant 0 : i32
    %c0_i32_0 = arith.constant 0 : i32
    %c0_i32_1 = arith.constant 0 : i32
    return %c0_i32, %c0_i32_0 : i32, i32
  }
  func.func @transform_4(%arg0: i32) -> (i32, i32) {
    %c0_i32 = arith.constant 0 : i32
    %c0_i32_0 = arith.constant 0 : i32
    %c0_i32_1 = arith.constant 0 : i32
    return %c0_i32, %c0_i32_0 : i32, i32
  }
  func.func @transform_5(%arg0: i32) -> (i32, i32) {
    %c0_i32 = arith.constant 0 : i32
    %c0_i32_0 = arith.constant 0 : i32
    %c0_i32_1 = arith.constant 0 : i32
    return %c0_i32, %c0_i32_0 : i32, i32
  }
  func.func @transform_6(%arg0: i32) -> (i32, i32) {
    %c0_i32 = arith.constant 0 : i32
    %c0_i32_0 = arith.constant 0 : i32
    return %c0_i32, %arg0 : i32, i32
  }
}

</mosaic_0001>

<bundles_post_ra>
// kernel: mlp_forward_fm.1
= control target key start
LH: loop header
LB: loop body
LE: loop exit
PB: predicated region body
PF: predicated region fallthrough
CT: control target
= control target key end

     0   :  { %vm66_vm0 = vcmask 1043456   ;;  %vm53_vm1 = vcmask 31744   ;;  %v677_v5 = vmov 0   ;;  %s823_s0 = inlined_call_operand.vmem [shape: f32[4,8], index: 0, kind: input, shape index: {}]   ;;  %s824_s1 = inlined_call_operand.vmem [shape: f32[98,1], index: 1, kind: input, shape index: {}]   ;;  %s825_s2 = inlined_call_operand.vmem [shape: f32[32,4], index: 2, kind: input, shape index: {}]   ;;  %s826_s3 = inlined_call_operand.vmem [shape: f32[32,32], index: 3, kind: input, shape index: {}]   ;;  %s827_s4 = inlined_call_operand.vmem [shape: f32[32,32], index: 4, kind: input, shape index: {}]   ;;  %s828_s5 = inlined_call_operand.vmem [shape: f32[2,32], index: 5, kind: input, shape index: {}]   ;;  %s829_s6 = inlined_call_operand.hbm [shape: f32[2,8], index: 6, kind: output, shape index: {}]  }
   0x1   :  { %v24_v0 = vld [vmem:[%s823_s0] sm:$0xf]  ;;  %v26_v2 = vld [vmem:[%s825_s2 + $0x8] sm:$0xff]  ;;  %v27_v3 = vld [vmem:[%s825_s2 + $0x10] sm:$0xff]  ;;  %627 = vset.pattern.permute.xlu0 %v677_v5  ;;  %628 = vset.pattern.permute.xlu1 %v677_v5 }
   0x2   :  { %v25_v1 = vld [vmem:[%s825_s2] sm:$0xff]  ;;  %553 = vmatprep.subr.msk.mxu0 %vm66_vm0, %v24_v0  ;;  %v31_v6 = vld [vmem:[%s824_s1 + $0x10] sm:$0xff]  ;;  %v28_v7 = vld [vmem:[%s825_s2 + $0x18] sm:$0xff] }
   0x3   :  { %555 = vmatprep.mubr.msk.f32.mxu0 %vm53_vm1, %v25_v1  ;;  %v29_v4 = vld [vmem:[%s824_s1] sm:$0xff]  ;;  %554 = vmatpush3.msk.msra.mxu0 %vm66_vm0, %v24_v0  ;;  %v30_v8 = vld [vmem:[%s824_s1 + $0x8] sm:$0xff]  ;;  %v32_v9 = vld [vmem:[%s824_s1 + $0x18] sm:$0xff] }
   0x4   :  { %556 = vmatmul.mubr.msk.f32.vlgmr.msra.gmra.mrb[0].mxu0 %vm53_vm1, %v26_v2  ;;  %35 = vperm.xlu0 %627, %v29_v4  }
   0x5   :  { %558 = vmatprep.mubr.msk.f32.mxu0 %vm53_vm1, %v27_v3  ;;  %45 = vperm.xlu1 %628, %v31_v6  }
   0x6   :  { %11 = vsyncpa [#allocation3], 0  ;;  %v163_v10 = vld [vmem:[%s824_s1 + $0x20] sm:$0xff]  ;;  %v164_v11 = vld [vmem:[%s824_s1 + $0x28] sm:$0xff]  ;;  %vm187_vm2 = vcmask 261120   ;;  %v678_v63 = vmov 0.0|0.0  }
   0x7   :  { %v165_v12 = vld [vmem:[%s824_s1 + $0x30] sm:$0xff]  ;;  %v166_v13 = vld [vmem:[%s824_s1 + $0x38] sm:$0xff]  ;;  %v293_v14 = vld [vmem:[%s824_s1 + $0x40] sm:$0xff]  ;;  %vm679_vm3 = vmmov 0   ;;  %v680_v0 = vmov 0.0   ;;  %s681_s20 = smov [#allocation2]  }
   0x8   :  { %559 = vmatmul.mubr.msk.f32.gmra.mrb[2].mxu0 %vm53_vm1, %v28_v7  ;;  %40 = vperm.xlu0 %627, %v30_v8   ;;  %v294_v15 = vld [vmem:[%s824_s1 + $0x48] sm:$0xff]  ;;  %v295_v16 = vld [vmem:[%s824_s1 + $0x50] sm:$0xff]  ;;  %v296_v17 = vld [vmem:[%s824_s1 + $0x58] sm:$0xff]  ;;  %s505_s21 = sshll.u32 %s681_s20, 4  ;;  %s506_s21 = int_to_ptr.vmem [resolvable:$true] %s505_s21 }
   0x9   :  { %50 = vperm.xlu1 %628, %v32_v9   ;;  %v419_v18 = vld [vmem:[%s824_s1 + $0x60] sm:$0x3]  ;;  %v160_v38 = vld [vmem:[%s826_s3 + $0x8] sm:$0xff]  ;;  %v161_v39 = vld [vmem:[%s826_s3 + $0x10] sm:$0xff]  ;;  %s653_s22 = scalar_lea.vmem %s506_s21, 32  ;;  %p658_p1 = scmp.lt.s32.totalorder %s506_s21, %s506_s21 }
   0xa   :  { %v159_v19 = vld [vmem:[%s826_s3] sm:$0xff]  ;;  %v162_v40 = vld [vmem:[%s826_s3 + $0x18] sm:$0xff]  ;;  %v290_v60 = vld [vmem:[%s827_s4 + $0x8] sm:$0xff]  ;;  %p654_p0 = scmp.ne.s32.totalorder %s506_s21, %s653_s22  ;;  %p659_p2 = scmp.lt.s32.totalorder %s653_s22, %s653_s22 }
   0xb   :  { %569 = vmatprep.mubr.msk.f32.mxu1 %vm187_vm2, %v159_v19  ;;  %v289_v41 = vld [vmem:[%s827_s4] sm:$0xff]  ;;  %v291_v61 = vld [vmem:[%s827_s4 + $0x10] sm:$0xff]  ;;  %v292_v62 = vld [vmem:[%s827_s4 + $0x18] sm:$0xff] }
   0xc   :  { %169 = vperm.xlu0 %627, %v163_v10   ;;  %583 = vmatprep.mubr.msk.f32.mxu0 %vm187_vm2, %v289_v41  ;;  %v418_v19 = vld [vmem:[%s828_s5] sm:$0x3]  ;;  %p660_p3 = por %p659_p2, %p658_p1 }
   0xd   :  { %174 = vperm.xlu1 %628, %v164_v11  }
   0xe   :  { %p661_p4 = pnand %p660_p3, %p654_p0 }
  0x10   :  { %179 = vperm.xlu0 %627, %v165_v12  }
  0x11   :  { %184 = vperm.xlu1 %628, %v166_v13  }
  0x14   :  { %299 = vperm.xlu0 %627, %v293_v14  }
  0x15   :  { %304 = vperm.xlu1 %628, %v294_v15  }
  0x18   :  { %309 = vperm.xlu0 %627, %v295_v16  }
  0x19   :  { %314 = vperm.xlu1 %628, %v296_v17  }
  0x1c   :  { %422 = vperm.xlu0 %627, %v419_v18  }
  0x83   :  { %v36_v20 = vpop.permute.xlu0 %35 }
  0x84   :  { %v46_v21 = vpop.permute.xlu1 %45 }
  0x87   :  { %v41_v22 = vpop.permute.xlu0 %40 }
  0x88   :  { %v51_v27 = vpop.permute.xlu1 %50 }
  0x8b   :  { %v170_v43 = vpop.permute.xlu0 %169 }
  0x8c   :  { %v175_v42 = vpop.permute.xlu1 %174 }
  0x8f   :  { %v180_v50 = vpop.permute.xlu0 %179 }
  0x90   :  { %v185_v48 = vpop.permute.xlu1 %184 }
  0x93   :  { %v300_v2 = vpop.permute.xlu0 %299 }
  0x94   :  { %v305_v1 = vpop.permute.xlu1 %304 }
  0x97   :  { %v310_v9 = vpop.permute.xlu0 %309 }
  0x98   :  { %v315_v7 = vpop.permute.xlu1 %314 }
  0xd7   :  { %v557_v23 = vpop.f32.mrb[0].mxu0 }
  0xd8   :  { %v142_v24 = vadd.f32 %v557_v23, %v41_v22  ;;  %v136_v25 = vpop.f32.mrb[1].mxu0 }
  0xd9   :  { %v137_v26 = vadd.f32 %v136_v25, %v36_v20  ;;  %v423_v20 = vpop.permute.xlu0 %422 }
  0xda   :  { %629 = vtanh.f32 %v142_v24 }
  0xdb   :  { %631 = vtanh.f32 %v137_v26  ;;  %v560_v28 = vpop.f32.mrb[2].mxu0 }
  0xdc   :  { %v152_v29 = vadd.f32 %v560_v28, %v51_v27  ;;  %v146_v30 = vpop.f32.mrb[3].mxu0 }
  0xdd   :  { %v147_v31 = vadd.f32 %v146_v30, %v46_v21 }
  0xde   :  { %633 = vtanh.f32 %v152_v29 }
  0xdf   :  { %635 = vtanh.f32 %v147_v31 }
  0xe4   :  { %v630_v32 = vpop.eup %629 }
  0xe5   :  { %v632_v33 = vpop.eup %631 }
  0xe6   :  { %v600_v34 = vpack.c.bf16 %v630_v32, %v632_v33 }
  0xe8   :  { %v634_v35 = vpop.eup %633  ;;  %601 = vmatprep.subr.bf16.mxu1 %v600_v34 }
  0xe9   :  { %v636_v36 = vpop.eup %635  ;;  %603 = vmatpush3.bf16.msra.mxu1 %v600_v34 }
  0xea   :  { %v604_v37 = vpack.c.bf16 %v634_v35, %v636_v36 }
  0xec   :  { %605 = vmatprep.subr.bf16.mxu1 %v604_v37 }
  0xed   :  { %607 = vmatpush3.bf16.msra.mxu1 %v604_v37 }
  0xee   :  { %616 = vmatprep.subr.bf16.mxu1 %v678_v63 }
  0xf0   :  { %570 = vmatmul.mubr.msk.f32.vlgmr.msra.gmra.mrb[0].mxu1 %vm187_vm2, %v160_v38 }
  0xf1   :  { %572 = vmatprep.mubr.msk.f32.mxu1 %vm187_vm2, %v161_v39 }
  0xf4   :  { %573 = vmatmul.mubr.msk.f32.gmra.mrb[2].mxu1 %vm187_vm2, %v162_v40 }
  0xf5   :  { %597 = vmatprep.mubr.msk.f32.mxu1 %vm679_vm3, %v680_v0 }
 0x1c3   :  { %v571_v44 = vpop.f32.mrb[0].mxu1 }
 0x1c4   :  { %v272_v45 = vadd.f32 %v571_v44, %v175_v42  ;;  %v266_v46 = vpop.f32.mrb[1].mxu1 }
 0x1c5   :  { %v267_v47 = vadd.f32 %v266_v46, %v170_v43 }
 0x1c6   :  { %637 = vtanh.f32 %v272_v45 }
 0x1c7   :  { %639 = vtanh.f32 %v267_v47  ;;  %v574_v49 = vpop.f32.mrb[2].mxu1 }
 0x1c8   :  { %v282_v51 = vadd.f32 %v574_v49, %v185_v48  ;;  %v276_v52 = vpop.f32.mrb[3].mxu1 }
 0x1c9   :  { %v277_v53 = vadd.f32 %v276_v52, %v180_v50 }
 0x1ca   :  { %641 = vtanh.f32 %v282_v51 }
 0x1cb   :  { %643 = vtanh.f32 %v277_v53 }
 0x1d0   :  { %v638_v54 = vpop.eup %637 }
 0x1d1   :  { %v640_v55 = vpop.eup %639 }
 0x1d2   :  { %v608_v56 = vpack.c.bf16 %v638_v54, %v640_v55 }
 0x1d4   :  { %v642_v57 = vpop.eup %641  ;;  %609 = vmatprep.subr.bf16.mxu0 %v608_v56 }
 0x1d5   :  { %v644_v58 = vpop.eup %643  ;;  %611 = vmatpush3.bf16.msra.mxu0 %v608_v56 }
 0x1d6   :  { %v612_v59 = vpack.c.bf16 %v642_v57, %v644_v58 }
 0x1d8   :  { %613 = vmatprep.subr.bf16.mxu0 %v612_v59 }
 0x1d9   :  { %615 = vmatpush3.bf16.msra.mxu0 %v612_v59 }
 0x1dc   :  { %584 = vmatmul.mubr.msk.f32.vlgmr.msra.gmra.mrb[4].mxu0 %vm187_vm2, %v290_v60 }
 0x1dd   :  { %586 = vmatprep.mubr.msk.f32.mxu0 %vm187_vm2, %v291_v61 }
 0x1e0   :  { %587 = vmatmul.mubr.msk.f32.gmra.mrb[6].mxu0 %vm187_vm2, %v292_v62 }
 0x2af   :  { %v585_v3 = vpop.f32.mrb[4].mxu0 }
 0x2b0   :  { %v401_v4 = vadd.f32 %v585_v3, %v305_v1  ;;  %v395_v5 = vpop.f32.mrb[5].mxu0 }
 0x2b1   :  { %v396_v6 = vadd.f32 %v395_v5, %v300_v2 }
 0x2b2   :  { %645 = vtanh.f32 %v401_v4 }
 0x2b3   :  { %647 = vtanh.f32 %v396_v6  ;;  %v588_v8 = vpop.f32.mrb[6].mxu0 }
 0x2b4   :  { %v411_v10 = vadd.f32 %v588_v8, %v315_v7  ;;  %v405_v11 = vpop.f32.mrb[7].mxu0 }
 0x2b5   :  { %v406_v12 = vadd.f32 %v405_v11, %v310_v9 }
 0x2b6   :  { %649 = vtanh.f32 %v411_v10 }
 0x2b7   :  { %651 = vtanh.f32 %v406_v12 }
 0x2bc   :  { %v646_v13 = vpop.eup %645 }
 0x2bd   :  { %v648_v14 = vpop.eup %647 }
 0x2be   :  { %v617_v15 = vpack.c.bf16 %v646_v13, %v648_v14 }
 0x2c0   :  { %v650_v16 = vpop.eup %649  ;;  %618 = vmatpush3.bf16.msra.mxu1 %v617_v15 }
 0x2c1   :  { %v652_v17 = vpop.eup %651  ;;  %619 = vmatprep.subr.bf16.mxu1 %v678_v63 }
 0x2c2   :  { %v620_v18 = vpack.c.bf16 %v650_v16, %v652_v17 }
 0x2c4   :  { %621 = vmatpush3.bf16.msra.mxu1 %v620_v18 }
 0x2c7   :  { %598 = vmatmul.mubr.msk.f32.vlgmr.msra.gmra.mrb[4].mxu1 %vm187_vm2, %v418_v19 }
 0x39a   :  { %v494_v21 = vpop.f32.mrb[4].mxu1 }
 0x39b   :  { %v495_v22 = vadd.f32 %v494_v21, %v423_v20  ;;  %v599_v23 = vpop.f32.mrb[5].mxu1 }
 0x39d   :  { %498 = vst [vmem:[#allocation2] sm:$0x3] %v495_v22 }
 0x39e   :  { %664 = shalt.err (!%p661_p4)
}
 0x39f   :  { %s665_s5 = scalar_lea.hbm %s829_s6, 32 }
 0x3a0   :  { %p666_p5 = scmp.ne.s32.totalorder %s829_s6, %s665_s5  ;;  %p669_p6 = scmp.lt.u32.totalorder %s665_s5, %s829_s6 }
 0x3a2   :  { %p671_p7 = pnand %p669_p6, %p666_p5 }
 0x3a4   :  { %674 = shalt.err (!%p671_p7)
}
 0x3a5   :  { %508 = dma.vmem_to_hbm [thread:$0]  %s506_s21, 32, %s829_s6, [#allocation3]  }
 0x3a6   :  { %675 = dma.done.wait [#allocation3], 32  }
 0x3a7   :  { %676 = vsyncadd [#allocation3], 4294967264 }
 0x3a8   :  { %512 = vsyncpa [#allocation3], 1 }

</bundles_post_ra>
